<compile_context>
chip_gen: v7x
topology: tpu7x:2x2x1
jax: 0.10.0
libtpu: 0.0.40
codegen_flags: <defaults>
</compile_context>

<pallas_src>
import jax
import jax.numpy as jnp
from jax.experimental import pallas as pl
from jax.experimental.pallas import tpu as pltpu

INPUT_DIM = 896
OUTPUT_DIM = 896


def energy_based_synapse(x, weight, dynamic_param, history, bias, *, tn=128):
    """Returns (output, energy, new_history)."""
    # Mirror the module's dim fixups.
    if x.ndim == 1:
        x = x[None, :]
    elif x.ndim == 3 and x.shape[0] == 1:   # torch .squeeze(0)
        x = x[0]

    x = x.astype(jnp.float32)
    B, I = x.shape
    O = weight.shape[0]
    assert O == I, "module's (dim,) gate broadcast over (O, I) requires O == I"
    assert O % tn == 0, "output dim must divide the weight-tile size"
    nb = O // tn

    # bf16 weight: halves the only significant HBM traffic (native MXU dtype).
    wb = weight.astype(jnp.bfloat16)                        # (O, I)
    dp2 = dynamic_param.reshape(1, O).astype(jnp.float32)   # (1, O)
    h2 = history.reshape(1, O).astype(jnp.float32)          # (1, O)
    b2 = bias.reshape(1, O).astype(jnp.float32)             # (1, O)

    def kernel(x_ref, w_ref, dp_ref, hfull_ref, hblk_ref, b_ref,
               out_ref, energy_ref, newh_ref,
               lhs_ref, esum_ref):
        j = pl.program_id(0)

        # Build the stacked lhs once; it stays resident across all weight tiles.
        @pl.when(j == 0)
        def _init():
            # Gate uses the OLD history (torch builds dynamic_weight before the
            # in-place history update).  Scaling x by the gate is exactly
            # equivalent to gating the weight columns (O == I), so no gated
            # weight copy is ever materialized.
            gate = jax.nn.sigmoid(dp_ref[...] + hfull_ref[...])        # (1, I)
            lhs_ref[:B, :] = (x_ref[...] * gate).astype(jnp.bfloat16)  # gated
            lhs_ref[B:, :] = x_ref[...].astype(jnp.bfloat16)           # raw
            esum_ref[...] = jnp.zeros_like(esum_ref)

        # One MXU pass per weight tile serves both the gated output rows and
        # the ungated history-probe rows.  w_ref block is (tn, I); contract
        # over the shared input axis (lhs @ w_blk.T), f32 accumulation.
        both = jax.lax.dot_general(
            lhs_ref[...], w_ref[...],
            dimension_numbers=(((1,), (1,)), ((), ())),
            preferred_element_type=jnp.float32)                        # (2B, tn)

        out_blk = both[:B] + b_ref[...]                                # (B, tn)
        out_ref[...] = out_blk

        # Per-row sum of squares, accumulated across weight tiles.
        esum_ref[...] += jnp.sum(out_blk * out_blk, axis=1, keepdims=True)

        # History update for this block of output units (uses OLD history).
        newh_ref[...] = (0.9 * hblk_ref[...]
                         + 0.1 * jnp.mean(jnp.tanh(both[B:]), axis=0,
                                          keepdims=True))

        @pl.when(j == pl.num_programs(0) - 1)
        def _fin():
            energy_ref[...] = esum_ref[...] * (1.0 / O)

    out, energy, new_hist = pl.pallas_call(
        kernel,
        out_shape=(
            jax.ShapeDtypeStruct((B, O), jnp.float32),
            jax.ShapeDtypeStruct((B, 1), jnp.float32),
            jax.ShapeDtypeStruct((1, O), jnp.float32),
        ),
        grid_spec=pltpu.PrefetchScalarGridSpec(
            num_scalar_prefetch=0,
            grid=(nb,),
            in_specs=[
                pl.BlockSpec((B, I), lambda j: (0, 0)),    # x (resident)
                pl.BlockSpec((tn, I), lambda j: (j, 0)),   # weight tile (streamed)
                pl.BlockSpec((1, O), lambda j: (0, 0)),    # dynamic_param (full)
                pl.BlockSpec((1, O), lambda j: (0, 0)),    # history (full, for gate)
                pl.BlockSpec((1, tn), lambda j: (0, j)),   # history (per-tile slice)
                pl.BlockSpec((1, tn), lambda j: (0, j)),   # bias (per-tile slice)
            ],
            out_specs=(
                pl.BlockSpec((B, tn), lambda j: (0, j)),   # output tile
                pl.BlockSpec((B, 1), lambda j: (0, 0)),    # energy (written at end)
                pl.BlockSpec((1, tn), lambda j: (0, j)),   # new history tile
            ),
            scratch_shapes=[
                pltpu.VMEM((2 * B, I), jnp.bfloat16),      # stacked lhs
                pltpu.VMEM((B, 1), jnp.float32),           # energy accumulator
            ],
        ),
        compiler_params=pltpu.CompilerParams(
            dimension_semantics=("arbitrary",),            # energy is a reduction
            vmem_limit_bytes=8 << 20,                      # live footprint < 1 MiB
        ),
    )(x, wb, dp2, h2, h2, b2)

    return out, energy, new_hist.reshape(O)


def _reference_f32(x, weight, dynamic_param, history, bias):
    # Pure f32 module semantics.
    gate = jax.nn.sigmoid(dynamic_param + history)     # (dim,) over weight's last axis
    dyn_w = weight * gate
    out = x @ dyn_w.T + bias
    energy = jnp.mean(out ** 2, axis=1, keepdims=True)
    new_hist = 0.9 * history + 0.1 * jnp.mean(jnp.tanh(x @ weight.T), axis=0)
    return out, energy, new_hist


def _reference_bf16(x, weight, dynamic_param, history, bias):
    # Same math as the kernel (bf16 matmul operands, f32 accumulation).
    gate = jax.nn.sigmoid(dynamic_param + history)
    wb = weight.astype(jnp.bfloat16)
    out = jnp.dot((x * gate).astype(jnp.bfloat16), wb.T,
                  preferred_element_type=jnp.float32) + bias
    energy = jnp.mean(out ** 2, axis=1, keepdims=True)
    raw = jnp.dot(x.astype(jnp.bfloat16), wb.T, preferred_element_type=jnp.float32)
    new_hist = 0.9 * history + 0.1 * jnp.mean(jnp.tanh(raw), axis=0)
    return out, energy, new_hist


if __name__ == "__main__":
    key = jax.random.PRNGKey(0)
    k_x, k_w, k_dp, k_h, k_b = jax.random.split(key, 5)

    B = 8
    DIM = INPUT_DIM
    x = jax.random.normal(k_x, (B, DIM), dtype=jnp.float32)

    # Weight scaled by 1/sqrt(dim) so the tanh history probe is not saturated
    # (per review: an unscaled randn weight makes that check insensitive).
    # Small non-zero dynamic_param / history / bias exercise every path.
    weight = jax.random.normal(k_w, (DIM, DIM), dtype=jnp.float32) / jnp.sqrt(DIM)
    dynamic_param = 0.1 * jax.random.normal(k_dp, (DIM,), dtype=jnp.float32)
    history = 0.1 * jax.random.normal(k_h, (DIM,), dtype=jnp.float32)
    bias = 0.1 * jax.random.normal(k_b, (DIM,), dtype=jnp.float32)

    out, energy, new_hist = energy_based_synapse(x, weight, dynamic_param, history, bias)
    jax.block_until_ready((out, energy, new_hist))

    assert out.shape == (B, DIM)
    assert energy.shape == (B, 1)
    assert new_hist.shape == (DIM,)

    # Tight check against a reference performing the identical bf16 matmuls.
    r_out, r_energy, r_hist = _reference_bf16(x, weight, dynamic_param, history, bias)
    assert jnp.allclose(out, r_out, rtol=1e-2, atol=1e-2), "output mismatch (bf16 ref)"
    assert jnp.allclose(energy, r_energy, rtol=1e-2, atol=1e-2), "energy mismatch (bf16 ref)"
    assert jnp.allclose(new_hist, r_hist, rtol=1e-2, atol=1e-2), "history mismatch (bf16 ref)"

    # Loose check against pure-f32 module semantics (difference is only the
    # bf16 quantization of the matmul operands).
    f_out, f_energy, f_hist = _reference_f32(x, weight, dynamic_param, history, bias)
    assert jnp.allclose(out, f_out, rtol=5e-2, atol=5e-2), "output mismatch (f32 ref)"
    assert jnp.allclose(energy, f_energy, rtol=5e-2, atol=5e-2), "energy mismatch (f32 ref)"
    assert jnp.allclose(new_hist, f_hist, rtol=5e-2, atol=5e-2), "history mismatch (f32 ref)"

    print("KERNEL_OK")
</pallas_src>

<mosaic_0001>
module attributes {stable_mosaic.version = 11 : i64} {
  func.func @kernel(%arg0: i32, %arg1: memref<8x896xf32, #tpu.memory_space<vmem>>, %arg2: memref<128x896xbf16, #tpu.memory_space<vmem>>, %arg3: memref<1x896xf32, #tpu.memory_space<vmem>>, %arg4: memref<1x896xf32, #tpu.memory_space<vmem>>, %arg5: memref<1x128xf32, #tpu.memory_space<vmem>>, %arg6: memref<1x128xf32, #tpu.memory_space<vmem>>, %arg7: memref<8x128xf32, #tpu.memory_space<vmem>>, %arg8: memref<8x1xf32, #tpu.memory_space<vmem>>, %arg9: memref<1x128xf32, #tpu.memory_space<vmem>>, %arg10: memref<16x896xbf16, #tpu.memory_space<vmem>>, %arg11: memref<8x1xf32, #tpu.memory_space<vmem>>) attributes {dimension_semantics = [#tpu.dimension_semantics<arbitrary>], iteration_bounds = array<i64: 7>, scalar_prefetch = 0 : i64, scratch_operands = 2 : i64, tpu.core_type = #tpu.core_type<tc>, window_params = [{pipeline_mode = #tpu.pipeline_mode<synchronous>, transform_indices = @transform_0, window_bounds = array<i64: 8, 896>}, {transform_indices = @transform_1, window_bounds = array<i64: 128, 896>}, {pipeline_mode = #tpu.pipeline_mode<synchronous>, transform_indices = @transform_2, window_bounds = array<i64: 1, 896>}, {pipeline_mode = #tpu.pipeline_mode<synchronous>, transform_indices = @transform_3, window_bounds = array<i64: 1, 896>}, {transform_indices = @transform_4, window_bounds = array<i64: 1, 128>}, {transform_indices = @transform_5, window_bounds = array<i64: 1, 128>}, {transform_indices = @transform_6, window_bounds = array<i64: 8, 128>}, {pipeline_mode = #tpu.pipeline_mode<synchronous>, transform_indices = @transform_7, window_bounds = array<i64: 8, 1>}, {transform_indices = @transform_8, window_bounds = array<i64: 1, 128>}]} {
    %c0_i32 = arith.constant 0 : i32
    %0 = arith.cmpi eq, %arg0, %c0_i32 : i32
    %1 = arith.extui %0 : i1 to i32
    %c0_i32_0 = arith.constant 0 : i32
    %2 = arith.cmpi ne, %1, %c0_i32_0 : i32
    scf.if %2 {
      %c0_22 = arith.constant 0 : index
      %c0_23 = arith.constant 0 : index
      %33 = vector.load %arg3[%c0_22, %c0_23] : memref<1x896xf32, #tpu.memory_space<vmem>>, vector<1x896xf32>
      %c0_24 = arith.constant 0 : index
      %c0_25 = arith.constant 0 : index
      %34 = vector.load %arg4[%c0_24, %c0_25] : memref<1x896xf32, #tpu.memory_space<vmem>>, vector<1x896xf32>
      %35 = arith.addf %33, %34 : vector<1x896xf32>
      %36 = arith.negf %35 : vector<1x896xf32>
      %37 = math.exp %36 : vector<1x896xf32>
      %cst_26 = arith.constant 1.000000e+00 : f32
      %38 = vector.broadcast %cst_26 : f32 to vector<1x896xf32>
      %39 = arith.addf %38, %37 : vector<1x896xf32>
      %40 = arith.divf %38, %39 : vector<1x896xf32>
      %c0_27 = arith.constant 0 : index
      %c0_28 = arith.constant 0 : index
      %41 = vector.load %arg1[%c0_27, %c0_28] : memref<8x896xf32, #tpu.memory_space<vmem>>, vector<8x896xf32>
      %42 = vector.broadcast %40 : vector<1x896xf32> to vector<8x896xf32>
      %43 = arith.mulf %41, %42 : vector<8x896xf32>
      %44 = arith.truncf %43 : vector<8x896xf32> to vector<8x896xbf16>
      %c0_29 = arith.constant 0 : index
      %c0_30 = arith.constant 0 : index
      %45 = vector.load %arg10[%c0_29, %c0_30] : memref<16x896xbf16, #tpu.memory_space<vmem>>, vector<8x896xbf16>
      tpu.vector_store %arg10[%c0_29, %c0_30], %44 {strides = array<i32>} : memref<16x896xbf16, #tpu.memory_space<vmem>>, vector<8x896xbf16>,
      %c0_31 = arith.constant 0 : index
      %c0_32 = arith.constant 0 : index
      %46 = vector.load %arg1[%c0_31, %c0_32] : memref<8x896xf32, #tpu.memory_space<vmem>>, vector<8x896xf32>
      %47 = arith.truncf %46 : vector<8x896xf32> to vector<8x896xbf16>
      %c8 = arith.constant 8 : index
      %c0_33 = arith.constant 0 : index
      %48 = vector.load %arg10[%c8, %c0_33] : memref<16x896xbf16, #tpu.memory_space<vmem>>, vector<8x896xbf16>
      tpu.vector_store %arg10[%c8, %c0_33], %47 {strides = array<i32>} : memref<16x896xbf16, #tpu.memory_space<vmem>>, vector<8x896xbf16>,
      %cst_34 = arith.constant 0.000000e+00 : f32
      %49 = vector.broadcast %cst_34 : f32 to vector<8x1xf32>
      %c0_35 = arith.constant 0 : index
      %c0_36 = arith.constant 0 : index
      %50 = vector.load %arg11[%c0_35, %c0_36] : memref<8x1xf32, #tpu.memory_space<vmem>>, vector<8x1xf32>
      tpu.vector_store %arg11[%c0_35, %c0_36], %49 {strides = array<i32>} : memref<8x1xf32, #tpu.memory_space<vmem>>, vector<8x1xf32>,
    } else {
    }
    %c0 = arith.constant 0 : index
    %c0_1 = arith.constant 0 : index
    %3 = vector.load %arg10[%c0, %c0_1] : memref<16x896xbf16, #tpu.memory_space<vmem>>, vector<16x896xbf16>
    %c0_2 = arith.constant 0 : index
    %c0_3 = arith.constant 0 : index
    %4 = vector.load %arg2[%c0_2, %c0_3] : memref<128x896xbf16, #tpu.memory_space<vmem>>, vector<128x896xbf16>
    %cst = arith.constant dense<0.000000e+00> : vector<16x128xf32>
    %5 = tpu.matmul %3, %4, %cst {dimension_numbers = #tpu.dot_dimension_numbers<[1], [1], [0], [0], [0, 0, 1, 0], [], []>} : vector<16x896xbf16>, vector<128x896xbf16>, vector<16x128xf32> -> vector<16x128xf32>
    %6 = vector.extract_strided_slice %5 {offsets = [0, 0], sizes = [8, 128], strides = [1, 1]} : vector<16x128xf32> to vector<8x128xf32>
    %c0_4 = arith.constant 0 : index
    %c0_5 = arith.constant 0 : index
    %7 = vector.load %arg6[%c0_4, %c0_5] : memref<1x128xf32, #tpu.memory_space<vmem>>, vector<1x128xf32>
    %8 = vector.broadcast %7 : vector<1x128xf32> to vector<8x128xf32>
    %9 = arith.addf %6, %8 : vector<8x128xf32>
    %c0_6 = arith.constant 0 : index
    %c0_7 = arith.constant 0 : index
    %10 = vector.load %arg7[%c0_6, %c0_7] : memref<8x128xf32, #tpu.memory_space<vmem>>, vector<8x128xf32>
    tpu.vector_store %arg7[%c0_6, %c0_7], %9 {strides = array<i32>} : memref<8x128xf32, #tpu.memory_space<vmem>>, vector<8x128xf32>,
    %c0_8 = arith.constant 0 : index
    %c0_9 = arith.constant 0 : index
    %11 = vector.load %arg11[%c0_8, %c0_9] : memref<8x1xf32, #tpu.memory_space<vmem>>, vector<8x1xf32>
    %12 = arith.mulf %9, %9 : vector<8x128xf32>
    %cst_10 = arith.constant dense<0.000000e+00> : vector<8xf32>
    %13 = vector.multi_reduction <add>, %12, %cst_10 [1] : vector<8x128xf32> to vector<8xf32>
    %14 = vector.shape_cast %13 : vector<8xf32> to vector<8x1xf32>
    %15 = arith.addf %11, %14 : vector<8x1xf32>
    %c0_11 = arith.constant 0 : index
    %c0_12 = arith.constant 0 : index
    %16 = vector.load %arg11[%c0_11, %c0_12] : memref<8x1xf32, #tpu.memory_space<vmem>>, vector<8x1xf32>
    tpu.vector_store %arg11[%c0_11, %c0_12], %15 {strides = array<i32>} : memref<8x1xf32, #tpu.memory_space<vmem>>, vector<8x1xf32>,
    %c0_13 = arith.constant 0 : index
    %c0_14 = arith.constant 0 : index
    %17 = vector.load %arg5[%c0_13, %c0_14] : memref<1x128xf32, #tpu.memory_space<vmem>>, vector<1x128xf32>
    %cst_15 = arith.constant 0.899999976 : f32
    %18 = vector.broadcast %cst_15 : f32 to vector<1x128xf32>
    %19 = arith.mulf %18, %17 : vector<1x128xf32>
    %20 = vector.extract_strided_slice %5 {offsets = [8, 0], sizes = [8, 128], strides = [1, 1]} : vector<16x128xf32> to vector<8x128xf32>
    %21 = math.tanh %20 : vector<8x128xf32>
    %cst_16 = arith.constant dense<0.000000e+00> : vector<128xf32>
    %22 = vector.multi_reduction <add>, %21, %cst_16 [0] : vector<8x128xf32> to vector<128xf32>
    %23 = vector.shape_cast %22 : vector<128xf32> to vector<1x128xf32>
    %cst_17 = arith.constant 8.000000e+00 : f32
    %24 = vector.broadcast %cst_17 : f32 to vector<1x128xf32>
    %25 = arith.divf %23, %24 : vector<1x128xf32>
    %cst_18 = arith.constant 1.000000e-01 : f32
    %26 = vector.broadcast %cst_18 : f32 to vector<1x128xf32>
    %27 = arith.mulf %26, %25 : vector<1x128xf32>
    %28 = arith.addf %19, %27 : vector<1x128xf32>
    %c0_19 = arith.constant 0 : index
    %c0_20 = arith.constant 0 : index
    %29 = vector.load %arg9[%c0_19, %c0_20] : memref<1x128xf32, #tpu.memory_space<vmem>>, vector<1x128xf32>
    tpu.vector_store %arg9[%c0_19, %c0_20], %28 {strides = array<i32>} : memref<1x128xf32, #tpu.memory_space<vmem>>, vector<1x128xf32>,
    %c6_i32 = arith.constant 6 : i32
    %30 = arith.cmpi eq, %arg0, %c6_i32 : i32
    %31 = arith.extui %30 : i1 to i32
    %c0_i32_21 = arith.constant 0 : i32
    %32 = arith.cmpi ne, %31, %c0_i32_21 : i32
    scf.if %32 {
      %c0_22 = arith.constant 0 : index
      %c0_23 = arith.constant 0 : index
      %33 = vector.load %arg11[%c0_22, %c0_23] : memref<8x1xf32, #tpu.memory_space<vmem>>, vector<8x1xf32>
      %cst_24 = arith.constant 0.00111607148 : f32
      %34 = vector.broadcast %cst_24 : f32 to vector<8x1xf32>
      %35 = arith.mulf %33, %34 : vector<8x1xf32>
      %c0_25 = arith.constant 0 : index
      %c0_26 = arith.constant 0 : index
      %36 = vector.load %arg8[%c0_25, %c0_26] : memref<8x1xf32, #tpu.memory_space<vmem>>, vector<8x1xf32>
      tpu.vector_store %arg8[%c0_25, %c0_26], %35 {strides = array<i32>} : memref<8x1xf32, #tpu.memory_space<vmem>>, vector<8x1xf32>,
    } else {
    }
    return
  }
  func.func @transform_0(%arg0: i32) -> (i32, i32) {
    %c0_i32 = arith.constant 0 : i32
    %c0_i32_0 = arith.constant 0 : i32
    %c0_i32_1 = arith.constant 0 : i32
    return %c0_i32, %c0_i32_0 : i32, i32
  }
  func.func @transform_1(%arg0: i32) -> (i32, i32) {
    %c0_i32 = arith.constant 0 : i32
    %c0_i32_0 = arith.constant 0 : i32
    return %arg0, %c0_i32 : i32, i32
  }
  func.func @transform_2(%arg0: i32) -> (i32, i32) {
    %c0_i32 = arith.constant 0 : i32
    %c0_i32_0 = arith.constant 0 : i32
    %c0_i32_1 = arith.constant 0 : i32
    return %c0_i32, %c0_i32_0 : i32, i32
  }
  func.func @transform_3(%arg0: i32) -> (i32, i32) {
    %c0_i32 = arith.constant 0 : i32
    %c0_i32_0 = arith.constant 0 : i32
    %c0_i32_1 = arith.constant 0 : i32
    return %c0_i32, %c0_i32_0 : i32, i32
  }
  func.func @transform_4(%arg0: i32) -> (i32, i32) {
    %c0_i32 = arith.constant 0 : i32
    %c0_i32_0 = arith.constant 0 : i32
    return %c0_i32, %arg0 : i32, i32
  }
  func.func @transform_5(%arg0: i32) -> (i32, i32) {
    %c0_i32 = arith.constant 0 : i32
    %c0_i32_0 = arith.constant 0 : i32
    return %c0_i32, %arg0 : i32, i32
  }
  func.func @transform_6(%arg0: i32) -> (i32, i32) {
    %c0_i32 = arith.constant 0 : i32
    %c0_i32_0 = arith.constant 0 : i32
    return %c0_i32, %arg0 : i32, i32
  }
  func.func @transform_7(%arg0: i32) -> (i32, i32) {
    %c0_i32 = arith.constant 0 : i32
    %c0_i32_0 = arith.constant 0 : i32
    %c0_i32_1 = arith.constant 0 : i32
    return %c0_i32, %c0_i32_0 : i32, i32
  }
  func.func @transform_8(%arg0: i32) -> (i32, i32) {
    %c0_i32 = arith.constant 0 : i32
    %c0_i32_0 = arith.constant 0 : i32
    return %c0_i32, %arg0 : i32, i32
  }
}

</mosaic_0001>

<bundles_post_ra>
// kernel: tpu_custom_call.1
= control target key start
LH: loop header
LB: loop body
LE: loop exit
PB: predicated region body
PF: predicated region fallthrough
CT: control target
= control target key end

     0   :  { %s2388_s0 = inlined_call_operand.hbm [shape: f32[8,896], index: 0, kind: input, shape index: {}]   ;;  %s2389_s1 = inlined_call_operand.hbm [shape: bf16[896,896], index: 1, kind: input, shape index: {}]   ;;  %s2390_s2 = inlined_call_operand.hbm [shape: f32[1,896], index: 2, kind: input, shape index: {}]   ;;  %s2391_s3 = inlined_call_operand.hbm [shape: f32[1,896], index: 3, kind: input, shape index: {}]   ;;  %s2392_s4 = inlined_call_operand.hbm [shape: f32[1,896], index: 4, kind: input, shape index: {}]   ;;  %s2393_s5 = inlined_call_operand.hbm [shape: f32[1,896], index: 5, kind: input, shape index: {}]   ;;  %s2394_s6 = inlined_call_operand.hbm [shape: f32[8,896], index: 6, kind: output, shape index: {0}]   ;;  %s2395_s7 = inlined_call_operand.vmem [shape: f32[8,1], index: 7, kind: output, shape index: {1}]   ;;  %s2396_s8 = inlined_call_operand.hbm [shape: f32[1,896], index: 8, kind: output, shape index: {2}]  }
   0x1   :  { %2412 = sst [smem:[#allocation30_spill]] %s2388_s0 }
   0x2   :  { %2413 = sst [smem:[#allocation31_spill]] %s2389_s1 }
   0x3   :  { %2414 = sst [smem:[#allocation32_spill]] %s2390_s2 }
   0x4   :  { %14 = vsyncpa [#allocation5], 0 }
   0x5   :  { %15 = vsyncpa [#allocation8], 0 }
   0x6   :  { %17 = vsyncpa [#allocation8 + $0x1], 0 }
   0x7   :  { %18 = vsyncpa [#allocation11], 0 }
   0x8   :  { %19 = vsyncpa [#allocation6], 0 }
   0x9   :  { %21 = vsyncpa [#allocation6 + $0x1], 0 }
   0xa   :  { %22 = vsyncpa [#allocation16], 0 }
   0xb   :  { %24 = vsyncpa [#allocation16 + $0x1], 0  ;;  %s1963_s27 = smov 0   ;;  %s1965_s28 = smov 0  }
   0xc   :  { %s1967_s29 = smov 0   ;;  %s1969_s30 = smov 0  }
   0xd LB: > { %2415 = sst [smem:[#allocation25_spill]] %s1891_s27  ;;  %s1984_s9 = sadd.s32 4294967295, %s1903_s30   ;;  %s1903_s30 = sphi %s1969_s30, %s2452_s30   ;;  %s1899_s29 = sphi %s1967_s29, %s2454_s29   ;;  %s1895_s28 = sphi %s1965_s28, %s2456_s28   ;;  %s1891_s27 = sphi %s1963_s27, %s2455_s27  }
   0xe   : > { %2416 = sst [smem:[#allocation26_spill]] %s1899_s29  ;;  %s1315_s10 = sadd.s32 4294967294, %s1903_s30  }
   0xf   : > { %s1988_s11 = sadd.s32 1, %s1903_s30   ;;  %s58_s12 = sadd.s32 1, %s1899_s29 }
  0x10   : > { %2417 = sst [smem:[#allocation27_spill]] %s1988_s11  ;;  %s55_s13 = ssub.s32 %s1903_s30, %s1988_s11 }
  0x11   : > { %p65_p0 = scmp.ne.s32.totalorder %s1899_s29, %s1895_s28  ;;  %p56_p1 = scmp.eq.s32.totalorder %s55_s13, 0 }
  0x12   : > { %p66_p2 = scmp.eq.s32.totalorder %s1903_s30, 0  ;;  %p71_p3 = scmp.ne.s32.totalorder %s1895_s28, %s1891_s27 }
  0x13   : > { %p2397_p4 = scmp.eq.s32.totalorder %s1984_s9, 0  ;;  %p189_p7 = scmp.eq.s32.totalorder %s1984_s9, 6 }
  0x14   : > { %s2000_s14 = scalar_select %p56_p1, %s1899_s29, %s58_s12  }
  0x15   : > { %p2002_p5 = por %p66_p2, %p65_p0  ;;  %p2008_p6 = por %p2397_p4, %p71_p3 }
  0x16   : > { %2418 = sst [smem:[#allocation28_spill]] %s2000_s14  ;;  %p195_p8 = scmp.eq.s32.totalorder %s1315_s10, 6 }
  0x17   : > { %s2420_s16 = scalar_select %p2008_p6, 1, 0 }
  0x18   : > { %p1316_p9 = scmp.ge.s32.totalorder %s1903_s30, 1  ;;  %p249_p10 = scmp.lt.s32.totalorder %s1903_s30, 8 }
  0x19   : > { %p2015_p11 = por %p189_p7, %p65_p0  ;;  %p2019_p12 = por %p195_p8, %p71_p3 }
  0x1a   : > { %p2023_p13 = pnand %p1316_p9, %p249_p10  ;;  %s1905_s20 = smov [#allocation9]  }
  0x1b   : > { %s2421_s17 = scalar_select %p2015_p11, 1, 0 }
  0x1c   : > { %s2422_s18 = scalar_select %p2019_p12, 1, 0 }
  0x1d   : > { %s2424_s19 = scalar_select %p2023_p13, 1, 0 }
  0x1e   : > { %2423 = sst [smem:[#allocation29_spill]] %s2422_s18  ;;  %p1450_p2 = pneg %p2023_p13 }
  0x1f   : > { %s273_s21 = sshll.u32 %s1905_s20, 4  ;;  %p1480_p4 = scmp.lt.s32.totalorder %s1903_s30, 7  ;;  %s274_s21 = int_to_ptr.vmem [resolvable:$true] %s273_s21 }
  0x20   : > { %p2425_p0 = scmp.eq.s32.totalorder %s1984_s9, 0  ;;  %s1906_s24 = smov [#allocation4]  }
  0x21   : > { %p2039_p3 = pnand %p1480_p4, %p2002_p5  ;;  %s262_s25 = sshll.u32 %s1906_s24, 4  ;;  %s2043_s25 = int_to_ptr.vmem [resolvable:$true] %s262_s25 }
  0x22   : > { %p2033_p7 = pnand %p1450_p2, %p2425_p0  ;;  %s2428_s2 = sld [smem:[#allocation32_spill]] }
  0x23   : > { %s2427_s23 = scalar_select %p2039_p3, 1, 0 }
  0x24   : > { %s2426_s22 = scalar_select %p2033_p7, 1, 0 }
  0x25   : > { %p2053_p9 = pneg %p2033_p7 }
  0x27   : > { %s2429_s15 = scalar_select %p2053_p9, 1, 0 }
  0x28   : > { %s1611_s12 = scalar_lea.hbm %s2428_s2, 112 }
  0x29   : > { %p1612_p8 = scmp.ne.s32.totalorder %s2428_s2, %s1611_s12  ;;  %p1618_p10 = scmp.lt.u32.totalorder %s1611_s12, %s2428_s2 }
  0x2b   : > { %p1614_p4 = pnand %p2053_p9, %p1612_p8 }
  0x2d   : > { %p1615_p5 = pneg %p1614_p4 }
  0x2f   : > { %p1620_p2 = pnand %p1618_p10, %p1615_p5 }
  0x31   : > { %1623 = shalt.err (!%p1620_p2)
}
  0x32   : > { %s1624_s26 = scalar_lea.vmem %s274_s21, 112  ;;  %s1631_s10 = scalar_lea.vmem %s274_s21, 128 }
  0x33   : > { %p1625_p0 = scmp.ne.s32.totalorder %s274_s21, %s1624_s26  ;;  %p1632_p11 = scmp.lt.s32.totalorder %s274_s21, %s274_s21 }
  0x34   : > { %p1633_p6 = scmp.lt.s32.totalorder %s1631_s10, %s1624_s26 }
  0x35   : > { %p1627_p1 = pnand %p1625_p0, %p2053_p9 }
  0x36   : > { %p1634_p13 = por %p1633_p6, %p1632_p11 }
  0x37   : > { %p1628_p12 = pneg %p1627_p1 }
  0x39   : > { %p1635_p3 = pnand %p1634_p13, %p1628_p12 }
  0x3b   : > { %1638 = shalt.err (!%p1635_p3)
}
  0x3c   : > { %1456 = dma.hbm_to_vmem [thread:$0]  (!%p2033_p7), %s2428_s2, 112, %s274_s21, [#allocation8]  }
  0x3d   : > { %s2406_s14 = sand.u32 1, %s1903_s30   ;;  %s2430_s0 = sld [smem:[#allocation30_spill]] }
  0x43   : > { %s1639_s11 = scalar_lea.hbm %s2430_s0, 896 }
  0x44   : > { %p1640_p1 = scmp.ne.s32.totalorder %s2430_s0, %s1639_s11  ;;  %p1646_p12 = scmp.lt.u32.totalorder %s1639_s11, %s2430_s0 }
  0x46   : > { %p1642_p6 = pnand %p1640_p1, %p2053_p9 }
  0x48   : > { %p1643_p11 = pneg %p1642_p6 }
  0x4a   : > { %p1648_p13 = pnand %p1646_p12, %p1643_p11 }
  0x4c   : > { %1651 = shalt.err (!%p1648_p13)
}
  0x4d   : > { %s1652_s21 = scalar_lea.vmem %s2043_s25, 896  ;;  %p1660_p5 = scmp.lt.s32.totalorder %s2043_s25, %s2043_s25 }
  0x4e   : > { %p1653_p3 = scmp.ne.s32.totalorder %s2043_s25, %s1652_s21  ;;  %p1661_p10 = scmp.lt.s32.totalorder %s1652_s21, %s1652_s21 }
  0x50   : > { %p1655_p8 = pnand %p1653_p3, %p2053_p9  ;;  %p1662_p2 = por %p1661_p10, %p1660_p5 }
  0x52   : > { %p1656_p4 = pneg %p1655_p8 }
  0x54   : > { %p1663_p0 = pnand %p1662_p2, %p1656_p4 }
  0x56   : > { %1666 = shalt.err (!%p1663_p0)
}
  0x57   : > { %1453 = dma.hbm_to_vmem [thread:$0]  (!%p2033_p7), %s2430_s0, 896, %s2043_s25, [#allocation5]  }
  0x58   : > { %s2094_s18 = sand.u32 1, %s1899_s29   ;;  %s1426_s20 = smul.u32 7168, %s1903_s30 }
  0x59   : > { %s1425_s13 = smul.u32 448, %s2094_s18  ;;  %s2431_s1 = sld [smem:[#allocation31_spill]] }
  0x5a   : > { %s1907_s27 = smov [#allocation10]   ;;  %s2109_s11 = scalar_lea.sflag [#allocation8], %s2406_s14 }
  0x5b   : > { %s299_s10 = scalar_lea.vmem [#allocation7], %s1425_s13  ;;  %s2105_s25 = sshll.u32 %s1907_s27, 4  ;;  %s285_s25 = int_to_ptr.vmem [resolvable:$true] %s2105_s25 }
  0x5c   : > { %s307_s21 = sshll.u32 %s299_s10, 4  ;;  %p2432_p6 = scmp.ne.s32.totalorder %s2427_s23, 0  ;;  %s2103_s21 = int_to_ptr.vmem [resolvable:$true] %s307_s21 }
  0x5e   : > { %p2115_p11 = pneg %p2432_p6 }
  0x5f   : > { %s2101_s26 = scalar_lea.hbm %s2431_s1, %s1426_s20  ;;  %s1672_s24 = scalar_lea.hbm %s2431_s1, 50176 }
  0x60   : > { %s1667_s0 = scalar_lea.hbm %s2101_s26, 7168  ;;  %p1673_p3 = scmp.lt.u32.totalorder %s2101_s26, %s2431_s1 }
  0x61   : > { %p1668_p1 = scmp.ne.s32.totalorder %s2101_s26, %s1667_s0  ;;  %p1674_p8 = scmp.lt.u32.totalorder %s1672_s24, %s1667_s0 }
  0x62   : > { %p1676_p5 = scmp.lt.u32.totalorder %s1667_s0, %s2101_s26 }
  0x63   : > { %p1670_p12 = pnand %p2115_p11, %p1668_p1  ;;  %p1675_p4 = por %p1674_p8, %p1673_p3 }
  0x65   : > { %p1671_p13 = pneg %p1670_p12  ;;  %p1677_p10 = por %p1676_p5, %p1675_p4 }
  0x67   : > { %p1678_p2 = pnand %p1677_p10, %p1671_p13 }
  0x69   : > { %1681 = shalt.err (!%p1678_p2)
}
  0x6a   : > { %s1682_s14 = scalar_lea.vmem %s2103_s21, 7168  ;;  %s1908_s13 = smov [#allocation7]  }
  0x6b   : > { %p1683_p0 = scmp.ne.s32.totalorder %s2103_s21, %s1682_s14  ;;  %s1687_s12 = sshll.u32 %s1908_s13, 4  ;;  %s1688_s12 = int_to_ptr.vmem [resolvable:$false] %s1687_s12 }
  0x6c   : > { %s1689_s10 = scalar_lea.vmem %s1688_s12, 14336  ;;  %p1690_p7 = scmp.lt.s32.totalorder %s2103_s21, %s1688_s12 }
  0x6d   : > { %p1685_p1 = pnand %p1683_p0, %p2115_p11  ;;  %p1691_p9 = scmp.lt.s32.totalorder %s1689_s10, %s1682_s14 }
  0x6f   : > { %p1686_p12 = pneg %p1685_p1  ;;  %p1692_p3 = por %p1691_p9, %p1690_p7 }
  0x71   : > { %p1693_p8 = pnand %p1692_p3, %p1686_p12 }
  0x73   : > { %1696 = shalt.err (!%p1693_p8)
}
  0x74   : > { %s1909_s0 = smov 448   ;;  %s1910_s24 = smov 28  }
  0x75   : > { %1463 = dma.hbm_to_vmem [thread:$0]  (!%p2432_p6), %s2101_s26, 7168, %s2103_s21, %s2109_s11, %s1909_s0, %s1909_s0, %s1910_s24  }
  0x76   : > { %s1697_s1 = scalar_lea.hbm %s2391_s3, 112  ;;  %p2434_p9 = scmp.ne.s32.totalorder %s2429_s15, 0 }
  0x77   : > { %p1698_p7 = scmp.ne.s32.totalorder %s2391_s3, %s1697_s1  ;;  %p1704_p5 = scmp.lt.u32.totalorder %s1697_s1, %s2391_s3 }
  0x79   : > { %p1700_p13 = pnand %p1698_p7, %p2434_p9 }
  0x7b   : > { %p1701_p4 = pneg %p1700_p13 }
  0x7d   : > { %p1706_p10 = pnand %p1704_p5, %p1701_p4 }
  0x7f   : > { %1709 = shalt.err (!%p1706_p10)
}
  0x80   : > { %s1710_s29 = scalar_lea.vmem %s285_s25, 112  ;;  %s1717_s26 = scalar_lea.vmem %s285_s25, 128 }
  0x81   : > { %p1711_p2 = scmp.ne.s32.totalorder %s285_s25, %s1710_s29  ;;  %p1718_p12 = scmp.lt.s32.totalorder %s285_s25, %s285_s25 }
  0x82   : > { %p1719_p3 = scmp.lt.s32.totalorder %s1717_s26, %s1710_s29 }
  0x83   : > { %p1713_p0 = pnand %p1711_p2, %p2434_p9 }
  0x84   : > { %p1720_p8 = por %p1719_p3, %p1718_p12 }
  0x85   : > { %p1714_p1 = pneg %p1713_p0 }
  0x87   : > { %p1721_p6 = pnand %p1720_p8, %p1714_p1 }
  0x89   : > { %1724 = shalt.err (!%p1721_p6)
}
  0x8a   : > { %p2435_p7 = scmp.ne.s32.totalorder %s2426_s22, 0  ;;  %s1324_s1 = sshll.u32 %s1903_s30, 4 }
  0x8b   : > { %s2164_s29 = scalar_lea.hbm %s2392_s4, %s1324_s1  ;;  %s320_s22 = scalar_lea.vmem [#allocation12], %s2094_s18 }
  0x8c   : > { %1459 = dma.hbm_to_vmem [thread:$0]  (!%p2435_p7), %s2391_s3, 112, %s285_s25, [#allocation11]  }
  0x8d   : > { %s327_s24 = sshll.u32 %s320_s22, 4  ;;  %s2436_s27 = sand.u32 1, %s1903_s30   ;;  %s328_s24 = int_to_ptr.vmem [resolvable:$true] %s327_s24 }
  0x8e   : > { %s318_s13 = scalar_lea.sflag [#allocation5], %s2436_s27  ;;  %s1725_s12 = scalar_lea.hbm %s2164_s29, 16 }
  0x8f   : > { %p1726_p6 = scmp.ne.s32.totalorder %s2164_s29, %s1725_s12  ;;  %s1730_s10 = scalar_lea.hbm %s2392_s4, 112 }
  0x90   : > { %p1731_p4 = scmp.lt.u32.totalorder %s2164_s29, %s2392_s4  ;;  %p1732_p5 = scmp.lt.u32.totalorder %s1730_s10, %s1725_s12 }
  0x91   : > { %p1728_p9 = pnand %p1726_p6, %p2115_p11  ;;  %p1734_p2 = scmp.lt.u32.totalorder %s1725_s12, %s2164_s29 }
  0x92   : > { %p1733_p10 = por %p1732_p5, %p1731_p4 }
  0x93   : > { %p1729_p13 = pneg %p1728_p9 }
  0x94   : > { %p1735_p0 = por %p1734_p2, %p1733_p10 }
  0x96   : > { %p1736_p1 = pnand %p1735_p0, %p1729_p13 }
  0x98   : > { %1739 = shalt.err (!%p1736_p1)
}
  0x99   : > { %s1740_s0 = scalar_lea.vmem %s328_s24, 16  ;;  %s1911_s2 = smov [#allocation12]  }
  0x9a   : > { %p1741_p12 = scmp.ne.s32.totalorder %s328_s24, %s1740_s0  ;;  %s1745_s15 = sshll.u32 %s1911_s2, 4  ;;  %s1746_s15 = int_to_ptr.vmem [resolvable:$false] %s1745_s15 }
  0x9b   : > { %s1747_s22 = scalar_lea.vmem %s1746_s15, 32  ;;  %p1748_p7 = scmp.lt.s32.totalorder %s328_s24, %s1746_s15 }
  0x9c   : > { %p1743_p3 = pnand %p1741_p12, %p2115_p11  ;;  %p1749_p6 = scmp.lt.s32.totalorder %s1747_s22, %s1740_s0 }
  0x9e   : > { %p1744_p8 = pneg %p1743_p3  ;;  %p1750_p9 = por %p1749_p6, %p1748_p7 }
  0xa0   : > { %p1751_p4 = pnand %p1750_p9, %p1744_p8 }
  0xa2   : > { %1754 = shalt.err (!%p1751_p4)
}
  0xa3   : > { %p2437_p5 = scmp.ne.s32.totalorder %s2427_s23, 0  ;;  %s2191_s25 = scalar_lea.hbm %s2393_s5, %s1324_s1 }
  0xa4   : > { %s337_s14 = scalar_lea.vmem [#allocation13], %s2094_s18  ;;  %s1755_s26 = scalar_lea.hbm %s2191_s25, 16 }
  0xa5   : > { %1466 = dma.hbm_to_vmem [thread:$0]  (!%p2437_p5), %s2164_s29, 16, %s328_s24, %s318_s13  }
  0xa6   : > { %s344_s10 = sshll.u32 %s337_s14, 4  ;;  %p1756_p13 = scmp.ne.s32.totalorder %s2191_s25, %s1755_s26  ;;  %s345_s10 = int_to_ptr.vmem [resolvable:$true] %s344_s10 }
  0xa7   : > { %s1760_s24 = scalar_lea.hbm %s2393_s5, 112  ;;  %p1761_p0 = scmp.lt.u32.totalorder %s2191_s25, %s2393_s5 }
  0xa8   : > { %p1758_p10 = pnand %p1756_p13, %p2115_p11  ;;  %p1762_p1 = scmp.lt.u32.totalorder %s1760_s24, %s1755_s26 }
  0xa9   : > { %p1764_p3 = scmp.lt.u32.totalorder %s1755_s26, %s2191_s25 }
  0xaa   : > { %p1759_p2 = pneg %p1758_p10  ;;  %p1763_p12 = por %p1762_p1, %p1761_p0 }
  0xac   : > { %p1765_p8 = por %p1764_p3, %p1763_p12 }
  0xae   : > { %p1766_p7 = pnand %p1765_p8, %p1759_p2 }
  0xb0   : > { %1769 = shalt.err (!%p1766_p7)
}
  0xb1   : > { %s1770_s18 = scalar_lea.vmem %s345_s10, 16  ;;  %s1912_s1 = smov [#allocation13]  }
  0xb2   : > { %p1771_p6 = scmp.ne.s32.totalorder %s345_s10, %s1770_s18  ;;  %s1775_s2 = sshll.u32 %s1912_s1, 4  ;;  %s1776_s2 = int_to_ptr.vmem [resolvable:$false] %s1775_s2 }
  0xb3   : > { %s1777_s15 = scalar_lea.vmem %s1776_s2, 32  ;;  %p1778_p13 = scmp.lt.s32.totalorder %s345_s10, %s1776_s2 }
  0xb4   : > { %p1773_p9 = pnand %p1771_p6, %p2115_p11  ;;  %p1779_p10 = scmp.lt.s32.totalorder %s1777_s15, %s1770_s18 }
  0xb6   : > { %p1774_p4 = pneg %p1773_p9  ;;  %p1780_p5 = por %p1779_p10, %p1778_p13 }
  0xb8   : > { %p1781_p0 = pnand %p1780_p5, %p1774_p4 }
  0xba   : > { %1784 = shalt.err (!%p1781_p0)
}
  0xbb   : > { %p2438_p1 = scmp.ne.s32.totalorder %s2427_s23, 0  ;;  %p2439_p2 = scmp.ne.s32.totalorder %s2424_s19, 0 }
  0xbc   : > { %p2440_p11 = scmp.eq.s32.totalorder (!%p2439_p2), %s1984_s9, 0 }
  0xbd   : > { %1469 = dma.hbm_to_vmem [thread:$0]  (!%p2438_p1), %s2191_s25, 16, %s345_s10, %s2109_s11  }
  0xbe   : > { %353 = sbr.rel (%p2439_p2) target bundleno = 808 (0x328), region = 44 }
  0xc5   : > { %1858 = dma.done.wait (%p2440_p11), [#allocation5], 896   ;;  %p2441_p12 = pmov %p2440_p11 }
  0xc6   : > { %s359_s20 = sand.u32 1, %s1984_s9   ;;  %s2220_s22 = sand.u32 1, %s1895_s28  }
  0xc7   : > { %1860 = vsyncadd (%p2441_p12), [#allocation5], 4294966400  ;;  %s1427_s23 = smul.u32 448, %s2220_s22  ;;  %s360_s27 = scalar_lea.sflag [#allocation8], %s359_s20 }
  0xc8   : > { %p2442_p5 = scmp.ne.s32.totalorder %s2420_s16, 0 }
  0xc9   : > { %s2223_s12 = scalar_lea.vmem [#allocation7], %s1427_s23 }
  0xca   : > { %1862 = dma.done.wait (%p2442_p5), %s360_s27, 7168  }
  0xcb   : > { %1864 = vsyncadd (%p2442_p5), %s360_s27, 4294960128  ;;  %p2443_p3 = pmov %p2440_p11 }
  0xcd   : > { %1866 = dma.done.wait (%p2443_p3), [#allocation8], 112   ;;  %p2444_p8 = pmov %p2443_p3 }
  0xce   : > { %p2445_p7 = pmov %p2443_p3 }
  0xcf   : > { %1868 = vsyncadd (%p2444_p8), [#allocation8], 4294967184 }
  0xd0   : > { %1870 = dma.done.wait (%p2445_p7), [#allocation11], 112   ;;  %p2446_p6 = pmov %p2443_p3 }
  0xd1   : > { %s377_s19 = scalar_lea.sflag [#allocation5], %s359_s20  ;;  %s379_s11 = scalar_lea.vmem [#allocation12], %s2220_s22 }
  0xd2   : > { %1872 = vsyncadd (%p2446_p6), [#allocation11], 4294967184 }
  0xd3   : > { %1874 = dma.done.wait (%p2442_p5), %s377_s19, 16  }
  0xd4   : > { %1876 = vsyncadd (%p2442_p5), %s377_s19, 4294967280  ;;  %s387_s25 = scalar_lea.vmem [#allocation13], %s2220_s22 }
  0xd5   : > { %1878 = dma.done.wait (%p2442_p5), %s360_s27, 16  }
  0xd6   : > { %1880 = vsyncadd (%p2442_p5), %s360_s27, 4294967280  ;;  %s1330_s14 = sshll.u32 %s2220_s22, 3  ;;  %s431_s26 = scalar_lea.vmem [#allocation15], %s2220_s22 }
  0xd7   : > { %s2248_s10 = scalar_lea.vmem [#allocation14], %s1330_s14  ;;  %p2447_p9 = scmp.ne.s32.totalorder %s1984_s9, 0 }
  0xd8   : > { %v438_v0 = vld [vmem:[#allocation9] sm:$0xff] (!%p2447_p9)  ;;  %v439_v1 = vld [vmem:[#allocation10] sm:$0xff] (!%p2447_p9)  ;;  %vm553_vm0 = vcmask (!%p2447_p9), 7168   ;;  %v448_v4 = vld [vmem:[#allocation4 + $0x8] sm:$0xff] (!%p2447_p9)  ;;  %v1913_v8 = vmov (!%p2447_p9), 0.0   ;;  %v455_v28 = vlaneseq (!%p2447_p9) }
  0xd9   : > { %437 = sbr.rel (%p2447_p9) target bundleno = 255 (0xff), region = 72  ;;  %v447_v2 = vld [vmem:[#allocation4] sm:$0xff] (!%p2447_p9)  ;;  %v440_v3 = vadd.f32 (!%p2447_p9), %v439_v1, %v438_v0  ;;  %v449_v5 = vld [vmem:[#allocation4 + $0x10] sm:$0xff] (!%p2447_p9)  ;;  %v450_v6 = vld [vmem:[#allocation4 + $0x18] sm:$0xff] (!%p2447_p9)  ;;  %554 = vst.msk [vmem:[#allocation3] sm:$0xff] (!%p2447_p9), %vm553_vm0, %v1913_v8  ;;  %v519_v11 = vpack.c.bf16 (!%p2447_p9), %v448_v4, %v448_v4 }
  0xda   : > { %v518_v7 = vpack.c.bf16 (!%p2447_p9), %v447_v2, %v447_v2  ;;  %v451_v9 = vld [vmem:[#allocation4 + $0x20] sm:$0xff] (!%p2447_p9)  ;;  %v452_v10 = vld [vmem:[#allocation4 + $0x28] sm:$0xff] (!%p2447_p9)  ;;  %v520_v12 = vpack.c.bf16 (!%p2447_p9), %v449_v5, %v449_v5  ;;  %v521_v13 = vpack.c.bf16 (!%p2447_p9), %v450_v6, %v450_v6  ;;  %v453_v18 = vld [vmem:[#allocation4 + $0x30] sm:$0xff] (!%p2447_p9)  ;;  %v456_v29 = vshrl.u32 (!%p2447_p9), %v455_v28, 7 }
  0xdb   : > { %v1332_v14 = vmul.f32 (!%p2447_p9), -1.442695, %v440_v3  ;;  %v522_v16 = vpack.c.bf16 (!%p2447_p9), %v451_v9, %v451_v9  ;;  %v523_v17 = vpack.c.bf16 (!%p2447_p9), %v452_v10, %v452_v10  ;;  %v533_v19 = vrot.slane (!%p2447_p9), %v519_v11, 4 }
  0xdc   : > { %v532_v15 = vrot.slane (!%p2447_p9), %v518_v7, 4  ;;  %v534_v20 = vrot.slane (!%p2447_p9), %v520_v12, 4  ;;  %v535_v21 = vrot.slane (!%p2447_p9), %v521_v13, 4  ;;  %v524_v24 = vpack.c.bf16 (!%p2447_p9), %v453_v18, %v453_v18 }
  0xdd   : > { %1525 = vpow2.f32 (!%p2447_p9), %v1332_v14  ;;  %v536_v22 = vrot.slane (!%p2447_p9), %v522_v16, 4  ;;  %v537_v23 = vrot.slane (!%p2447_p9), %v523_v17, 4  ;;  %547 = vst [vmem:[#allocation2 + $0x8] sm:$0xf0] (!%p2447_p9), %v533_v19  ;;  %v457_v30 = vsub.s32 (!%p2447_p9), 0, %v456_v29 }
  0xde   : > { %546 = vst [vmem:[#allocation2] sm:$0xf0] (!%p2447_p9), %v532_v15  ;;  %548 = vst [vmem:[#allocation2 + $0x10] sm:$0xf0] (!%p2447_p9), %v534_v20  ;;  %v538_v25 = vrot.slane (!%p2447_p9), %v524_v24, 4  ;;  %v461_v31 = vsub.s32 (!%p2447_p9), 1, %v456_v29 }
  0xdf   : > { %549 = vst [vmem:[#allocation2 + $0x18] sm:$0xf0] (!%p2447_p9), %v535_v21  ;;  %550 = vst [vmem:[#allocation2 + $0x20] sm:$0xf0] (!%p2447_p9), %v536_v22  ;;  %v465_v32 = vsub.s32 (!%p2447_p9), 2, %v456_v29  ;;  %v469_v33 = vsub.s32 (!%p2447_p9), 3, %v456_v29 }
  0xe0   : > { %551 = vst [vmem:[#allocation2 + $0x28] sm:$0xf0] %v537_v23  ;;  %552 = vst [vmem:[#allocation2 + $0x30] sm:$0xf0] %v538_v25  ;;  %v473_v34 = vsub.s32 4, %v456_v29  ;;  %v477_v35 = vsub.s32 5, %v456_v29 }
  0xe1   : > { %v481_v36 = vsub.s32 6, %v456_v29 }
  0xe7   : > { %v1526_v26 = vpop.eup %1525 }
  0xe8   : > { %v444_v27 = vadd.f32 1.0, %v1526_v26 }
  0xea   : > { %1527 = vrcp.f32 %v444_v27 }
  0xf4   : > { %v1528_v37 = vpop.eup %1527 }
  0xf5   : > { %v458_v38 = vrot.slane %v1528_v37, %v457_v30  ;;  %v462_v39 = vrot.slane %v1528_v37, %v461_v31  ;;  %v466_v40 = vrot.slane %v1528_v37, %v465_v32  ;;  %v470_v41 = vrot.slane %v1528_v37, %v469_v33 }
  0xf6   : > { %v474_v42 = vrot.slane %v1528_v37, %v473_v34  ;;  %v478_v43 = vrot.slane %v1528_v37, %v477_v35  ;;  %v482_v44 = vrot.slane %v1528_v37, %v481_v36 }
  0xf7   : > { %v490_v45 = vmul.f32 %v458_v38, %v447_v2  ;;  %v491_v46 = vmul.f32 %v462_v39, %v448_v4  ;;  %v492_v47 = vmul.f32 %v466_v40, %v449_v5  ;;  %v493_v48 = vmul.f32 %v470_v41, %v450_v6 }
  0xf8   : > { %v494_v49 = vmul.f32 %v474_v42, %v451_v9  ;;  %v495_v50 = vmul.f32 %v478_v43, %v452_v10  ;;  %v496_v51 = vmul.f32 %v482_v44, %v453_v18 }
  0xf9   : > { %v497_v52 = vpack.c.bf16 %v490_v45, %v490_v45  ;;  %v498_v53 = vpack.c.bf16 %v491_v46, %v491_v46  ;;  %v499_v54 = vpack.c.bf16 %v492_v47, %v492_v47  ;;  %v500_v55 = vpack.c.bf16 %v493_v48, %v493_v48 }
  0xfa   : > { %v501_v56 = vpack.c.bf16 %v494_v49, %v494_v49  ;;  %v502_v57 = vpack.c.bf16 %v495_v50, %v495_v50  ;;  %v503_v58 = vpack.c.bf16 %v496_v51, %v496_v51 }
  0xfb   : > { %504 = vst [vmem:[#allocation2] sm:$0xf] %v497_v52  ;;  %505 = vst [vmem:[#allocation2 + $0x8] sm:$0xf] %v498_v53 }
  0xfc   : > { %506 = vst [vmem:[#allocation2 + $0x10] sm:$0xf] %v499_v54  ;;  %507 = vst [vmem:[#allocation2 + $0x18] sm:$0xf] %v500_v55 }
  0xfd   : > { %508 = vst [vmem:[#allocation2 + $0x20] sm:$0xf] %v501_v56  ;;  %509 = vst [vmem:[#allocation2 + $0x28] sm:$0xf] %v502_v57 }
  0xfe   : > { %510 = vst [vmem:[#allocation2 + $0x30] sm:$0xf] %v503_v58 }
  0xff PF: > { %v1529_v59 = vld [vmem:[%s2223_s12 + $0x4] ss:$28 sps:$4 sm:$0xff]   ;;  %v1531_v60 = vld [vmem:[%s2223_s12 + $0xc] ss:$28 sps:$4 sm:$0xff]   ;;  %v1535_v63 = vld [vmem:[%s2223_s12 + $0x3c] ss:$28 sps:$4 sm:$0xff]  }
 0x100   : > { %914 = vmatprep.subr.bf16.mxu0 %v1529_v59  ;;  %v1533_v61 = vld [vmem:[%s2223_s12] ss:$28 sps:$4 sm:$0xff]   ;;  %v1534_v62 = vld [vmem:[%s2223_s12 + $0x8] ss:$28 sps:$4 sm:$0xff]   ;;  %955 = vmatprep.subr.bf16.mxu1 %v1531_v60  ;;  %v1539_v1 = vld [vmem:[%s2223_s12 + $0x38] ss:$28 sps:$4 sm:$0xff]  }
 0x101   : > { %915 = vmatpush1.bf16.xpose.msra.mxu0 %v1533_v61  ;;  %956 = vmatpush1.bf16.xpose.msra.mxu1 %v1534_v62  ;;  %v1537_v0 = vld [vmem:[%s2223_s12 + $0x44] ss:$28 sps:$4 sm:$0xff]   ;;  %v1541_v3 = vld [vmem:[%s2223_s12 + $0x74] ss:$28 sps:$4 sm:$0xff]   ;;  %v1543_v4 = vld [vmem:[%s2223_s12 + $0x7c] ss:$28 sps:$4 sm:$0xff]  }
 0x102   : > { %916 = vmatprep.subr.bf16.mxu0 %v1535_v63  ;;  %957 = vmatprep.subr.bf16.mxu1 %v1537_v0  ;;  %v1540_v2 = vld [vmem:[%s2223_s12 + $0x40] ss:$28 sps:$4 sm:$0xff]   ;;  %v1545_v5 = vld [vmem:[%s2223_s12 + $0x70] ss:$28 sps:$4 sm:$0xff]   ;;  %v1546_v6 = vld [vmem:[%s2223_s12 + $0x78] ss:$28 sps:$4 sm:$0xff]  }
 0x103   : > { %v1547_v7 = vld [vmem:[%s2223_s12 + $0xac] ss:$28 sps:$4 sm:$0xff]   ;;  %v1549_v8 = vld [vmem:[%s2223_s12 + $0xb4] ss:$28 sps:$4 sm:$0xff]   ;;  %v1553_v13 = vld [vmem:[%s2223_s12 + $0xe4] ss:$28 sps:$4 sm:$0xff]  }
 0x104   : > { %v556_v9 = vld [vmem:[#allocation2 + $0x8] sm:$0xff]  ;;  %v1551_v11 = vld [vmem:[%s2223_s12 + $0xa8] ss:$28 sps:$4 sm:$0xff]   ;;  %v1557_v15 = vld [vmem:[%s2223_s12 + $0xe0] ss:$28 sps:$4 sm:$0xff]   ;;  %v1914_v30 = vmov 0.0  }
 0x105   : > { %v558_v10 = vld [vmem:[#allocation2 + $0x18] sm:$0xff]  ;;  %946 = vmatprep.mubr.bf16.mxu0 %v556_v9  ;;  %v1552_v12 = vld [vmem:[%s2223_s12 + $0xb0] ss:$28 sps:$4 sm:$0xff]   ;;  %v1559_v17 = vld [vmem:[%s2223_s12 + $0x11c] ss:$28 sps:$4 sm:$0xff]   ;;  %vm1915_vm1 = vmmov 0  }
 0x106   : > { %987 = vmatprep.mubr.bf16.mxu1 %v558_v10  ;;  %v1555_v14 = vld [vmem:[%s2223_s12 + $0xec] ss:$28 sps:$4 sm:$0xff]   ;;  %v1561_v18 = vld [vmem:[%s2223_s12 + $0x124] ss:$28 sps:$4 sm:$0xff]   ;;  %v1563_v19 = vld [vmem:[%s2223_s12 + $0x118] ss:$28 sps:$4 sm:$0xff]  }
 0x107   : > { %v1558_v16 = vld [vmem:[%s2223_s12 + $0xe8] ss:$28 sps:$4 sm:$0xff]   ;;  %v1564_v20 = vld [vmem:[%s2223_s12 + $0x120] ss:$28 sps:$4 sm:$0xff]   ;;  %v1565_v21 = vld [vmem:[%s2223_s12 + $0x154] ss:$28 sps:$4 sm:$0xff]  }
 0x108   : > { %v1567_v22 = vld [vmem:[%s2223_s12 + $0x15c] ss:$28 sps:$4 sm:$0xff]   ;;  %v1569_v23 = vld [vmem:[%s2223_s12 + $0x150] ss:$28 sps:$4 sm:$0xff]   ;;  %v1575_v27 = vld [vmem:[%s2223_s12 + $0x188] ss:$28 sps:$4 sm:$0xff]  }
 0x109   : > { %917 = vmatpush1.bf16.xpose.msra.mxu0 %v1539_v1  ;;  %958 = vmatpush1.bf16.xpose.msra.mxu1 %v1540_v2  ;;  %v1570_v24 = vld [vmem:[%s2223_s12 + $0x158] ss:$28 sps:$4 sm:$0xff]   ;;  %v1571_v25 = vld [vmem:[%s2223_s12 + $0x18c] ss:$28 sps:$4 sm:$0xff]   ;;  %v1587_v39 = vld [vmem:[%s2223_s12 + $0x84] ss:$28 sps:$4 sm:$0xff]  }
 0x10a   : > { %918 = vmatprep.subr.bf16.mxu0 %v1541_v3  ;;  %959 = vmatprep.subr.bf16.mxu1 %v1543_v4  ;;  %v1573_v26 = vld [vmem:[%s2223_s12 + $0x194] ss:$28 sps:$4 sm:$0xff]   ;;  %v555_v31 = vld [vmem:[#allocation2] sm:$0xff]  ;;  %v557_v32 = vld [vmem:[#allocation2 + $0x10] sm:$0xff]  ;;  %vm1092_vm2 = vcmask 7168   ;;  %p1390_p4 = scmp.ne.s32.totalorder %s1984_s9, 6 }
 0x10b   : > { %v1576_v28 = vld [vmem:[%s2223_s12 + $0x190] ss:$28 sps:$4 sm:$0xff]   ;;  %v1580_v34 = vld [vmem:[%s2223_s12 + $0x18] ss:$28 sps:$4 sm:$0xff]   ;;  %v1581_v37 = vld [vmem:[%s2223_s12 + $0x48] ss:$28 sps:$4 sm:$0xff]  }
 0x10c   : > { %v1579_v29 = vld [vmem:[%s2223_s12 + $0x14] ss:$28 sps:$4 sm:$0xff]   ;;  %v1583_v35 = vld [vmem:[%s2223_s12 + $0x4c] ss:$28 sps:$4 sm:$0xff]   ;;  %v1585_v40 = vld [vmem:[%s2223_s12 + $0x80] ss:$28 sps:$4 sm:$0xff]  }
 0x10d   : > { %v1577_v33 = vld [vmem:[%s2223_s12 + $0x10] ss:$28 sps:$4 sm:$0xff]   ;;  %v1588_v41 = vld [vmem:[%s2223_s12 + $0x88] ss:$28 sps:$4 sm:$0xff]   ;;  %v1591_v42 = vld [vmem:[%s2223_s12 + $0xbc] ss:$28 sps:$4 sm:$0xff]  }
 0x10e   : > { %v560_v36 = vld [vmem:[#allocation2 + $0x28] sm:$0xff]  ;;  %v1592_v44 = vld [vmem:[%s2223_s12 + $0xc0] ss:$28 sps:$4 sm:$0xff]   ;;  %v1599_v48 = vld [vmem:[%s2223_s12 + $0x12c] ss:$28 sps:$4 sm:$0xff]  }
 0x10f   : > { %v1584_v38 = vld [vmem:[%s2223_s12 + $0x50] ss:$28 sps:$4 sm:$0xff]   ;;  %v1589_v43 = vld [vmem:[%s2223_s12 + $0xb8] ss:$28 sps:$4 sm:$0xff]   ;;  %v1597_v49 = vld [vmem:[%s2223_s12 + $0x128] ss:$28 sps:$4 sm:$0xff]  }
 0x110   : > { %v1595_v45 = vld [vmem:[%s2223_s12 + $0xf4] ss:$28 sps:$4 sm:$0xff]   ;;  %v1603_v51 = vld [vmem:[%s2223_s12 + $0x164] ss:$28 sps:$4 sm:$0xff]   ;;  %v1607_v54 = vld [vmem:[%s2223_s12 + $0x19c] ss:$28 sps:$4 sm:$0xff]  }
 0x111   : > { %919 = vmatpush1.bf16.xpose.msra.mxu0 %v1545_v5  ;;  %960 = vmatpush1.bf16.xpose.msra.mxu1 %v1546_v6  ;;  %v1593_v46 = vld [vmem:[%s2223_s12 + $0xf0] ss:$28 sps:$4 sm:$0xff]   ;;  %v1596_v47 = vld [vmem:[%s2223_s12 + $0xf8] ss:$28 sps:$4 sm:$0xff]   ;;  %v1601_v52 = vld [vmem:[%s2223_s12 + $0x160] ss:$28 sps:$4 sm:$0xff]  }
 0x112   : > { %920 = vmatprep.subr.bf16.mxu0 %v1547_v7  ;;  %961 = vmatprep.subr.bf16.mxu1 %v1549_v8  ;;  %v1600_v50 = vld [vmem:[%s2223_s12 + $0x130] ss:$28 sps:$4 sm:$0xff]   ;;  %v1604_v53 = vld [vmem:[%s2223_s12 + $0x168] ss:$28 sps:$4 sm:$0xff]   ;;  %v1605_v55 = vld [vmem:[%s2223_s12 + $0x198] ss:$28 sps:$4 sm:$0xff]  }
 0x113   : > { %v1608_v56 = vld [vmem:[%s2223_s12 + $0x1a0] ss:$28 sps:$4 sm:$0xff]   ;;  %v559_v57 = vld [vmem:[#allocation2 + $0x20] sm:$0xff] }
 0x114   : > { %v561_v58 = vld [vmem:[#allocation2 + $0x30] sm:$0xff] }
 0x119   : > { %921 = vmatpush1.bf16.xpose.msra.mxu0 %v1551_v11  ;;  %962 = vmatpush1.bf16.xpose.msra.mxu1 %v1552_v12  ;;  %v1389_v12 = vld [vmem:[%s387_s25] ss:$0 sm:$0xff] }
 0x11a   : > { %922 = vmatprep.subr.bf16.mxu0 %v1553_v13  ;;  %963 = vmatprep.subr.bf16.mxu1 %v1555_v14 }
 0x121   : > { %923 = vmatpush1.bf16.xpose.msra.mxu0 %v1557_v15  ;;  %964 = vmatpush1.bf16.xpose.msra.mxu1 %v1558_v16 }
 0x122   : > { %924 = vmatprep.subr.bf16.mxu0 %v1559_v17  ;;  %965 = vmatprep.subr.bf16.mxu1 %v1561_v18 }
 0x129   : > { %925 = vmatpush1.bf16.xpose.msra.mxu0 %v1563_v19  ;;  %966 = vmatpush1.bf16.xpose.msra.mxu1 %v1564_v20 }
 0x12a   : > { %926 = vmatprep.subr.bf16.mxu0 %v1565_v21  ;;  %967 = vmatprep.subr.bf16.mxu1 %v1567_v22 }
 0x131   : > { %927 = vmatpush1.bf16.xpose.msra.mxu0 %v1569_v23  ;;  %968 = vmatpush1.bf16.xpose.msra.mxu1 %v1570_v24 }
 0x132   : > { %928 = vmatprep.subr.bf16.mxu0 %v1571_v25  ;;  %969 = vmatprep.subr.bf16.mxu1 %v1573_v26  ;;  %v1094_v26 = vld [vmem:[%s379_s11] sm:$0x1] }
 0x139   : > { %929 = vmatpush1.bf16.xpose.msra.mxu0 %v1575_v27  ;;  %970 = vmatpush1.bf16.xpose.msra.mxu1 %v1576_v28  ;;  %v1095_v28 = vmul.f32 0.9, %v1094_v26 }
 0x13a   : > { %996 = vmatprep.subr.bf16.mxu0 %v1579_v29  ;;  %1405 = vmatprep.subr.bf16.mxu1 %v1914_v30 }
 0x140   : > { %947 = vmatmul.mubr.bf16.vlgmr.msra.gmra.mrb[0].mxu0 %v555_v31  ;;  %988 = vmatmul.mubr.bf16.vlgmr.msra.gmra.mrb[0].mxu1 %v557_v32  ;;  %v1087_v32 = vld [vmem:[#allocation3] sm:$0xff] }
 0x141   : > { %997 = vmatpush1.bf16.xpose.msra.mxu0 %v1577_v33  ;;  %1406 = vmatpush3.bf16.xpose.msra.mxu1 %v1580_v34 }
 0x142   : > { %998 = vmatprep.subr.bf16.mxu0 %v1583_v35  ;;  %1407 = vmatprep.subr.bf16.mxu1 %v1914_v30 }
 0x143   : > { %1028 = vmatprep.mubr.bf16.mxu0 %v560_v36  ;;  %1421 = vmatprep.mubr.msk.bf16.mxu1 %vm1915_vm1, %v1914_v30 }
 0x149   : > { %999 = vmatpush1.bf16.xpose.msra.mxu0 %v1581_v37  ;;  %1408 = vmatpush3.bf16.xpose.msra.mxu1 %v1584_v38 }
 0x14a   : > { %1000 = vmatprep.subr.bf16.mxu0 %v1587_v39  ;;  %1409 = vmatprep.subr.bf16.mxu1 %v1914_v30 }
 0x151   : > { %1001 = vmatpush1.bf16.xpose.msra.mxu0 %v1585_v40  ;;  %1410 = vmatpush3.bf16.xpose.msra.mxu1 %v1588_v41 }
 0x152   : > { %1002 = vmatprep.subr.bf16.mxu0 %v1591_v42  ;;  %1411 = vmatprep.subr.bf16.mxu1 %v1914_v30 }
 0x159   : > { %1003 = vmatpush1.bf16.xpose.msra.mxu0 %v1589_v43  ;;  %1412 = vmatpush3.bf16.xpose.msra.mxu1 %v1592_v44 }
 0x15a   : > { %1004 = vmatprep.subr.bf16.mxu0 %v1595_v45  ;;  %1413 = vmatprep.subr.bf16.mxu1 %v1914_v30 }
 0x161   : > { %1005 = vmatpush1.bf16.xpose.msra.mxu0 %v1593_v46  ;;  %1414 = vmatpush3.bf16.xpose.msra.mxu1 %v1596_v47 }
 0x162   : > { %1006 = vmatprep.subr.bf16.mxu0 %v1599_v48  ;;  %1415 = vmatprep.subr.bf16.mxu1 %v1914_v30 }
 0x169   : > { %1007 = vmatpush1.bf16.xpose.msra.mxu0 %v1597_v49  ;;  %1416 = vmatpush3.bf16.xpose.msra.mxu1 %v1600_v50 }
 0x16a   : > { %1008 = vmatprep.subr.bf16.mxu0 %v1603_v51  ;;  %1417 = vmatprep.subr.bf16.mxu1 %v1914_v30 }
 0x171   : > { %1009 = vmatpush1.bf16.xpose.msra.mxu0 %v1601_v52  ;;  %1418 = vmatpush3.bf16.xpose.msra.mxu1 %v1604_v53 }
 0x172   : > { %1010 = vmatprep.subr.bf16.mxu0 %v1607_v54  ;;  %1419 = vmatprep.subr.bf16.mxu1 %v1914_v30 }
 0x179   : > { %1011 = vmatpush1.bf16.xpose.msra.mxu0 %v1605_v55  ;;  %1420 = vmatpush3.bf16.xpose.msra.mxu1 %v1608_v56 }
 0x180   : > { %1029 = vmatmul.mubr.bf16.vlgmr.msra.gmra.mrb[4].mxu0 %v559_v57  ;;  %1422 = vmatmul.mubr.bf16.vlgmr.msra.gmra.mrb[4].mxu1 %v561_v58 }
 0x213   : > { %v948_v59 = vpop.f32.mrb[0].mxu0  ;;  %v989_v60 = vpop.f32.mrb[0].mxu1 }
 0x214   : > { %v990_v61 = vadd.f32 %v989_v60, %v948_v59  ;;  %v950_v62 = vpop.f32.mrb[1].mxu0  ;;  %v991_v63 = vpop.f32.mrb[1].mxu1 }
 0x215   : > { %v951_v0 = vpop.f32.mrb[2].mxu0  ;;  %v992_v1 = vpop.f32.mrb[2].mxu1 }
 0x216   : > { %v993_v2 = vadd.f32 %v992_v1, %v951_v0  ;;  %v953_v3 = vpop.f32.mrb[3].mxu0  ;;  %v994_v4 = vpop.f32.mrb[3].mxu1 }
 0x253   : > { %v1030_v5 = vpop.f32.mrb[4].mxu0  ;;  %v1071_v6 = vpop.f32.mrb[4].mxu1 }
 0x254   : > { %v1031_v7 = vadd.f32 %v1030_v5, %v990_v61  ;;  %v1032_v8 = vpop.f32.mrb[5].mxu0  ;;  %v1423_v9 = vpop.f32.mrb[5].mxu1 }
 0x255   : > { %v1033_v10 = vpop.f32.mrb[6].mxu0  ;;  %v1074_v11 = vpop.f32.mrb[6].mxu1 }
 0x256   : > { %v1072_v13 = vadd.f32 %v1071_v6, %v1031_v7  ;;  %v1034_v14 = vadd.f32 %v1033_v10, %v993_v2  ;;  %v1035_v15 = vpop.f32.mrb[7].mxu0  ;;  %v1424_v16 = vpop.f32.mrb[7].mxu1 }
 0x258   : > { %v1075_v17 = vadd.f32 %v1074_v11, %v1034_v14  ;;  %v1085_v18 = vadd.f32 %v1389_v12, %v1072_v13 }
 0x25a   : > { %1609 = vtanh.f32 %v1075_v17  ;;  %1086 = vst [vmem:[%s2248_s10] sm:$0xff] %v1085_v18  ;;  %v1088_v19 = vmul.f32 %v1085_v18, %v1085_v18 }
 0x25c   : > { %1089 = vadd.xlane.f32.xlu0 %v1088_v19 }
 0x264   : > { %v1610_v20 = vpop.eup %1609 }
 0x265   : > { %v1097_v21 = vrot.slane %v1610_v20, 4 }
 0x267   : > { %v1098_v22 = vadd.f32 %v1610_v20, %v1097_v21 }
 0x269   : > { %v1099_v23 = vrot.slane %v1098_v22, 2 }
 0x26b   : > { %v1100_v24 = vadd.f32 %v1099_v23, %v1098_v22 }
 0x26d   : > { %v1101_v25 = vrot.slane %v1100_v24, 1 }
 0x26f   : > { %v1102_v27 = vadd.f32 %v1101_v25, %v1100_v24 }
 0x271   : > { %v1104_v29 = vmul.f32 0.125, %v1102_v27 }
 0x273   : > { %v1105_v30 = vmul.f32 0.1, %v1104_v29 }
 0x275   : > { %v1106_v31 = vadd.f32 %v1105_v30, %v1095_v28 }
 0x277   : > { %1107 = vst [vmem:[%s431_s26] sm:$0x1] %v1106_v31 }
 0x2e6   : > { %1111 = sbr.rel (%p1390_p4) target bundleno = 759 (0x2f7), region = 76 }
 0x2e9   : > { %v1090_v33 = vpop.xlane.xlu0 %1089 }
 0x2ea   : > { %v1091_v34 = vadd.f32 %v1090_v33, %v1087_v32 }
 0x2ec   : > { %1093 = vst.msk [vmem:[#allocation3] sm:$0xff] %vm1092_vm2, %v1091_v34 }
 0x2f3   : > { %v1112_v35 = vld [vmem:[#allocation3] sm:$0xff] }
 0x2f4   : > { %v1113_v36 = vmul.f32 0.0011160715, %v1112_v35 }
 0x2f6   : > { %1114 = vst.msk [vmem:[%s2395_s7] sm:$0xff] %vm1092_vm2, %v1113_v36 }
 0x2f7 PF: > { %s1392_s29 = sshll.u32 %s1984_s9, 7  ;;  %s1133_s18 = sshll.u32 %s2248_s10, 4  ;;  %s1134_s18 = int_to_ptr.vmem [resolvable:$true] %s1133_s18 }
 0x2f8   : > { %s2324_s0 = scalar_lea.hbm %s2394_s6, %s1392_s29  ;;  %s1116_s1 = scalar_lea.sflag [#allocation6], %s2220_s22 }
 0x2f9   : > { %s1785_s2 = scalar_lea.vmem %s1134_s18, 128  ;;  %p2448_p10 = scmp.ne.s32.totalorder %s2421_s17, 0 }
 0x2fa   : > { %p1786_p13 = scmp.ne.s32.totalorder %s1134_s18, %s1785_s2  ;;  %s1916_s15 = smov [#allocation14]  }
 0x2fb   : > { %s1789_s20 = sshll.u32 %s1916_s15, 4  ;;  %s1790_s20 = int_to_ptr.vmem [resolvable:$false] %s1789_s20 }
 0x2fc   : > { %p1787_p0 = pnand %p1786_p13, %p2448_p10  ;;  %s1791_s23 = scalar_lea.vmem %s1790_s20, 256 }
 0x2fd   : > { %p1792_p2 = scmp.lt.s32.totalorder %s1134_s18, %s1790_s20  ;;  %p1793_p11 = scmp.lt.s32.totalorder %s1791_s23, %s1785_s2 }
 0x2fe   : > { %p1788_p1 = pneg %p1787_p0 }
 0x2ff   : > { %p1794_p12 = por %p1793_p11, %p1792_p2 }
 0x301   : > { %p1795_p5 = pnand %p1794_p12, %p1788_p1 }
 0x303   : > { %1798 = shalt.err (!%p1795_p5)
}
 0x304   : > { %s1799_s27 = scalar_lea.hbm %s2324_s0, 128  ;;  %s1803_s11 = scalar_lea.hbm %s2394_s6, 896 }
 0x305   : > { %p1800_p3 = scmp.ne.s32.totalorder %s2324_s0, %s1799_s27  ;;  %p1804_p6 = scmp.lt.u32.totalorder %s2324_s0, %s2394_s6 }
 0x306   : > { %p1805_p9 = scmp.lt.u32.totalorder %s1803_s11, %s1799_s27  ;;  %p1807_p13 = scmp.lt.u32.totalorder %s1799_s27, %s2324_s0 }
 0x307   : > { %p1801_p8 = pnand %p1800_p3, %p2448_p10 }
 0x308   : > { %p1806_p4 = por %p1805_p9, %p1804_p6 }
 0x309   : > { %p1802_p7 = pneg %p1801_p8 }
 0x30a   : > { %p1808_p0 = por %p1807_p13, %p1806_p4 }
 0x30c   : > { %p1809_p1 = pnand %p1808_p0, %p1802_p7 }
 0x30e   : > { %1812 = shalt.err (!%p1809_p1)
}
 0x30f   : > { %1446 = dma.vmem_to_hbm [thread:$0]  (%p2448_p10), %s1134_s18, 128, %s2324_s0, %s1116_s1  }
 0x310   : > { %s1393_s10 = sshll.u32 %s1984_s9, 4  ;;  %s1149_s16 = sshll.u32 %s431_s26, 4  ;;  %s1150_s16 = int_to_ptr.vmem [resolvable:$true] %s1149_s16 }
 0x311   : > { %s2351_s24 = scalar_lea.hbm %s2396_s8, %s1393_s10  ;;  %s1121_s13 = scalar_lea.sflag [#allocation16], %s2220_s22 }
 0x312   : > { %s1813_s2 = scalar_lea.vmem %s1150_s16, 16  ;;  %s1917_s15 = smov [#allocation15]  }
 0x313   : > { %p1814_p2 = scmp.ne.s32.totalorder %s1150_s16, %s1813_s2  ;;  %s1817_s20 = sshll.u32 %s1917_s15, 4  ;;  %s1818_s20 = int_to_ptr.vmem [resolvable:$false] %s1817_s20 }
 0x314   : > { %s1819_s23 = scalar_lea.vmem %s1818_s20, 32  ;;  %p1820_p5 = scmp.lt.s32.totalorder %s1150_s16, %s1818_s20 }
 0x315   : > { %p1815_p11 = pnand %p1814_p2, %p2448_p10  ;;  %p1821_p3 = scmp.lt.s32.totalorder %s1819_s23, %s1813_s2 }
 0x317   : > { %p1816_p12 = pneg %p1815_p11  ;;  %p1822_p8 = por %p1821_p3, %p1820_p5 }
 0x319   : > { %p1823_p7 = pnand %p1822_p8, %p1816_p12 }
 0x31b   : > { %1826 = shalt.err (!%p1823_p7)
}
 0x31c   : > { %s1827_s9 = scalar_lea.hbm %s2351_s24, 16  ;;  %s1831_s0 = scalar_lea.hbm %s2396_s8, 112 }
 0x31d   : > { %p1828_p6 = scmp.ne.s32.totalorder %s2351_s24, %s1827_s9  ;;  %p1832_p13 = scmp.lt.u32.totalorder %s2351_s24, %s2396_s8 }
 0x31e   : > { %p1833_p0 = scmp.lt.u32.totalorder %s1831_s0, %s1827_s9  ;;  %p1835_p2 = scmp.lt.u32.totalorder %s1827_s9, %s2351_s24 }
 0x31f   : > { %p1829_p9 = pnand %p1828_p6, %p2448_p10 }
 0x320   : > { %p1834_p1 = por %p1833_p0, %p1832_p13 }
 0x321   : > { %p1830_p4 = pneg %p1829_p9 }
 0x322   : > { %p1836_p11 = por %p1835_p2, %p1834_p1 }
 0x324   : > { %p1837_p12 = pnand %p1836_p11, %p1830_p4 }
 0x326   : > { %1840 = shalt.err (!%p1837_p12)
}
 0x327   : > { %1447 = dma.vmem_to_hbm [thread:$0]  (%p2448_p10), %s1150_s16, 16, %s2351_s24, %s1121_s13  }
 0x328 PF: > { %s2449_s27 = sld [smem:[#allocation25_spill]]  ;;  %s2450_s12 = sld [smem:[#allocation29_spill]] }
 0x329   : > { %p1484_p5 = scmp.ge.s32.totalorder %s1903_s30, 2 }
 0x32e   : > { %s1164_s19 = sand.u32 1, %s2449_s27   ;;  %p2451_p3 = scmp.ne.s32.totalorder %s2450_s12, 0 }
 0x32f   : > { %s1165_s11 = scalar_lea.sflag [#allocation6], %s1164_s19 }
 0x330   : > { %p1471_p8 = pnand %p1484_p5, %p2451_p3 }
 0x332   : > { %1882 = dma.done.wait (!%p1471_p8), %s1165_s11, 128  }
 0x333   : > { %1884 = vsyncadd (!%p1471_p8), %s1165_s11, 4294967168  ;;  %s1174_s25 = scalar_lea.sflag [#allocation16], %s1164_s19 }
 0x334   : > { %1886 = dma.done.wait (!%p1471_p8), %s1174_s25, 16  }
 0x335   : > { %1888 = vsyncadd (!%p1471_p8), %s1174_s25, 4294967280  ;;  %s2452_s30 = sld [smem:[#allocation27_spill]]  ;;  %s2453_s14 = sld [smem:[#allocation26_spill]] }
 0x336   : > { %s2454_s29 = sld [smem:[#allocation28_spill]]  ;;  %s2455_s27 = smov %s1895_s28 }
 0x33b   : > { %p27_p10 = scmp.ge.s32.totalorder %s2452_s30, 9   ;;  %s2456_s28 = smov %s2453_s14 }
 0x33d   :  { %29 = sbr.rel (!%p27_p10) target bundleno = 13 (0xd), region = 157 }
 0x344   :  { %1178 = vsyncpa [#allocation5], 1 }
 0x345   :  { %1180 = vsyncpa [#allocation5 + $0x1], 1 }
 0x346   :  { %1181 = vsyncpa [#allocation8], 1 }
 0x347   :  { %1183 = vsyncpa [#allocation8 + $0x1], 1 }
 0x348   :  { %1184 = vsyncpa [#allocation11], 1 }
 0x349   :  { %1185 = vsyncpa [#allocation6], 1 }
 0x34a   :  { %1187 = vsyncpa [#allocation6 + $0x1], 1 }
 0x34b   :  { %1188 = vsyncpa [#allocation16], 1 }
 0x34c   :  { %1190 = vsyncpa [#allocation16 + $0x1], 1 }

</bundles_post_ra>
